<compile_context>
chip_gen: v6e
topology: v6e:2x2x1
jax: 0.10.0
libtpu: 0.0.40
codegen_flags: <defaults>
</compile_context>

<pallas_src>
import math

import jax
import jax.numpy as jnp
from jax import lax
from jax.experimental import pallas as pl
from jax.experimental.pallas import tpu as pltpu


_LANE_BLOCK = 256                 # input lanes per kernel row -> two 128-lane outputs
_MAX_ROW_TILE = 4096              # 4096 x 256 x 4B = 4 MiB input block per grid step
_VMEM_LIMIT = 32 * 1024 * 1024    # explicit scoped-VMEM budget (safe on v5e/v6e/v7x)


def _sublane_quantum(dtype):
    """Rows of `dtype` filling one (8, 128) 32-bit vreg tile (8/16/32)."""
    return 8 * (4 // jnp.dtype(dtype).itemsize)


def _deinterleave_kernel(x_ref, even_ref, odd_ref):
    """Even/odd lane de-interleave.

    x_ref: (TR, 256); even_ref/odd_ref: (TR, 128) with
      even_ref[r, j] = x_ref[r, 2j],  odd_ref[r, j] = x_ref[r, 2j + 1].

    Each 128-lane half is unshuffled with 6 in-vreg rotate+select stages
    (pure XLU/VPU, exact for any dtype); one 64-lane cross-vreg combine then
    builds the [evens | odds] outputs.
    """
    tr, lb = x_ref.shape
    half = lb // 2              # 128
    quarter = half // 2         # 64
    chunk = min(_sublane_quantum(x_ref.dtype), tr)
    num_chunks = tr // chunk    # exact: wrapper guarantees tr % quantum == 0 or tr == chunk
    n_stages = int(math.log2(half)) - 1

    # ---- Loop-invariant masks: built ONCE per kernel invocation (not per chunk).
    lane = lax.broadcasted_iota(jnp.int32, (chunk, half), 1)
    # Rotation-direction probe: all-True iff pltpu.roll follows the jnp.roll
    # convention out[p] = in[p - shift]; masks adapt to either convention.
    fwd = pltpu.roll(lane, 1, axis=1) == ((lane - 1) & (half - 1))
    bwd = jnp.logical_not(fwd)

    stages = []
    for s in range(n_stages):
        h = 1 << s
        # Lane groups of 4h: [A B C D] (each h wide) -> [A C B D].
        grp = (lane >> s) & 3
        need_right = grp == 1            # wants the element h lanes to the right
        need_left = grp == 2             # wants the element h lanes to the left
        take_a = (fwd & need_left) | (bwd & need_right)     # uses roll(y, h)
        take_b = (fwd & need_right) | (bwd & need_left)     # uses roll(y, half - h)
        stages.append((h, take_a, take_b))
    low_lanes = lane < quarter           # lanes 0..63

    def unshuffle128(y):
        # (chunk, 128) -> [evens | odds]; every roll is a single in-vreg rotate.
        for h, take_a, take_b in stages:
            ra = pltpu.roll(y, h, axis=1)
            rb = pltpu.roll(y, half - h, axis=1)
            y = jnp.where(take_a, ra, jnp.where(take_b, rb, y))
        return y

    def body(c, carry):
        r0 = c * chunk
        if not isinstance(r0, int):
            r0 = pl.multiple_of(r0, chunk)
        rows = pl.ds(r0, chunk)
        h0 = unshuffle128(x_ref[rows, pl.ds(0, half)])       # [e0..e63   | o0..o63  ]
        h1 = unshuffle128(x_ref[rows, pl.ds(half, half)])    # [e64..e127 | o64..o127]
        # Cross-vreg combine; a 64-lane shift is direction-agnostic (64 == -64 mod 128).
        even_ref[rows, :] = jnp.where(low_lanes, h0, pltpu.roll(h1, quarter, axis=1))
        odd_ref[rows, :] = jnp.where(low_lanes, pltpu.roll(h0, quarter, axis=1), h1)
        return carry

    unroll = next(u for u in (2, 1) if num_chunks % u == 0)
    lax.fori_loop(0, num_chunks, body, 0, unroll=unroll)


def _pick_row_tile(rows, quantum):
    """Large row tile, multiple of `quantum`; capped so that (when possible)
    there are >= 2 grid blocks for v7x's two TensorCores."""
    cap = _MAX_ROW_TILE
    if rows >= 2 * quantum:
        cap = min(cap, pl.cdiv(rows, 2))
    tr = min(rows, cap)
    if tr >= quantum:
        tr = (tr // quantum) * quantum
    return tr


def splitting_forward(x):
    """Pallas equivalent of Splitting.forward: (x[..., ::2], x[..., 1::2])."""
    B, C, H, W = x.shape
    itemsize = jnp.dtype(x.dtype).itemsize
    total = B * C * H * W

    # Rare shapes stay off the hot Pallas path instead of paying pad/copy cost.
    # TODO(synk): no dedicated Pallas path for odd W (PyTorch ceil/floor halves)
    # or flat sizes not divisible by 256; those use plain XLA strided slicing.
    if (W % 2 != 0) or (total == 0) or (total % _LANE_BLOCK != 0) \
            or itemsize not in (1, 2, 4):
        return x[:, :, :, 0::2], x[:, :, :, 1::2]

    rows = total // _LANE_BLOCK
    quantum = _sublane_quantum(x.dtype)
    tr = _pick_row_tile(rows, quantum)
    grid = (pl.cdiv(rows, tr),)
    half = _LANE_BLOCK // 2

    x2 = x.reshape(rows, _LANE_BLOCK)            # free row-major reshape
    even2, odd2 = pl.pallas_call(
        _deinterleave_kernel,
        out_shape=(jax.ShapeDtypeStruct((rows, half), x.dtype),
                   jax.ShapeDtypeStruct((rows, half), x.dtype)),
        grid=grid,
        in_specs=[pl.BlockSpec((tr, _LANE_BLOCK), lambda i: (i, 0))],
        out_specs=(pl.BlockSpec((tr, half), lambda i: (i, 0)),
                   pl.BlockSpec((tr, half), lambda i: (i, 0))),
        compiler_params=pltpu.CompilerParams(
            dimension_semantics=("parallel",),
            vmem_limit_bytes=_VMEM_LIMIT),
        cost_estimate=pl.CostEstimate(flops=0, transcendentals=0,
                                      bytes_accessed=2 * total * itemsize),
    )(x2)

    return even2.reshape(B, C, H, W // 2), odd2.reshape(B, C, H, W // 2)


def _check(x):
    even, odd = jax.jit(splitting_forward)(x)
    jax.block_until_ready((even, odd))
    ref_even = x[:, :, :, 0::2]
    ref_odd = x[:, :, :, 1::2]
    assert even.shape == ref_even.shape and odd.shape == ref_odd.shape
    assert jnp.array_equal(even, ref_even), "even split mismatch"
    assert jnp.array_equal(odd, ref_odd), "odd split mismatch"


if __name__ == "__main__":
    key = jax.random.PRNGKey(0)
    k0, k1, k2, k3 = jax.random.split(key, 4)

    # Primary small shape implied by the module.
    _check(jax.random.normal(k0, (2, 4, 16, 16), dtype=jnp.float32))
    # Multi-block / multi-chunk path (rows=64 -> 2 grid blocks, 4 row chunks).
    _check(jax.random.normal(k1, (2, 4, 32, 64), dtype=jnp.float32))
    # Ragged last grid block (rows=10 with 8-row tiles).
    _check(jax.random.normal(k2, (2, 4, 5, 64), dtype=jnp.float32))
    # Odd-W fallback path (XLA slicing).
    _check(jax.random.normal(k3, (2, 4, 16, 7), dtype=jnp.float32))

    print("KERNEL_OK")
</pallas_src>

<mosaic_0001>
module attributes {stable_mosaic.version = 11 : i64} {
  func.func @_deinterleave_kernel(%arg0: i32, %arg1: memref<8x256xf32, #tpu.memory_space<vmem>>, %arg2: memref<8x128xf32, #tpu.memory_space<vmem>>, %arg3: memref<8x128xf32, #tpu.memory_space<vmem>>) attributes {dimension_semantics = [#tpu.dimension_semantics<parallel>], iteration_bounds = array<i64: 1>, scalar_prefetch = 0 : i64, scratch_operands = 0 : i64, tpu.core_type = #tpu.core_type<tc>, window_params = [{transform_indices = @transform_0, window_bounds = array<i64: 8, 256>}, {transform_indices = @transform_1, window_bounds = array<i64: 8, 128>}, {transform_indices = @transform_2, window_bounds = array<i64: 8, 128>}]} {
    %0 = tpu.iota {dimensions = array<i32: 1>} : vector<8x128xi32>
    %c1_i32 = arith.constant 1 : i32
    %1 = tpu.dynamic_rotate %0 by %c1_i32 dim 1 : vector<8x128xi32>, i32 -> vector<8x128xi32>
    %c1_i32_0 = arith.constant 1 : i32
    %2 = vector.broadcast %c1_i32_0 : i32 to vector<8x128xi32>
    %3 = arith.subi %0, %2 : vector<8x128xi32>
    %c127_i32 = arith.constant 127 : i32
    %4 = vector.broadcast %c127_i32 : i32 to vector<8x128xi32>
    %5 = arith.andi %3, %4 : vector<8x128xi32>
    %6 = arith.cmpi eq, %1, %5 : vector<8x128xi32>
    %cst = arith.constant dense<true> : vector<8x128xi1>
    %7 = arith.xori %6, %cst : vector<8x128xi1>
    %c0_i32 = arith.constant 0 : i32
    %8 = vector.broadcast %c0_i32 : i32 to vector<8x128xi32>
    %9 = arith.shrsi %0, %8 : vector<8x128xi32>
    %c3_i32 = arith.constant 3 : i32
    %10 = vector.broadcast %c3_i32 : i32 to vector<8x128xi32>
    %11 = arith.andi %9, %10 : vector<8x128xi32>
    %c1_i32_1 = arith.constant 1 : i32
    %12 = vector.broadcast %c1_i32_1 : i32 to vector<8x128xi32>
    %13 = arith.cmpi eq, %11, %12 : vector<8x128xi32>
    %c2_i32 = arith.constant 2 : i32
    %14 = vector.broadcast %c2_i32 : i32 to vector<8x128xi32>
    %15 = arith.cmpi eq, %11, %14 : vector<8x128xi32>
    %16 = arith.andi %6, %15 : vector<8x128xi1>
    %17 = arith.andi %7, %13 : vector<8x128xi1>
    %18 = arith.ori %16, %17 : vector<8x128xi1>
    %19 = arith.andi %6, %13 : vector<8x128xi1>
    %20 = arith.andi %7, %15 : vector<8x128xi1>
    %21 = arith.ori %19, %20 : vector<8x128xi1>
    %c1_i32_2 = arith.constant 1 : i32
    %22 = vector.broadcast %c1_i32_2 : i32 to vector<8x128xi32>
    %23 = arith.shrsi %0, %22 : vector<8x128xi32>
    %c3_i32_3 = arith.constant 3 : i32
    %24 = vector.broadcast %c3_i32_3 : i32 to vector<8x128xi32>
    %25 = arith.andi %23, %24 : vector<8x128xi32>
    %c1_i32_4 = arith.constant 1 : i32
    %26 = vector.broadcast %c1_i32_4 : i32 to vector<8x128xi32>
    %27 = arith.cmpi eq, %25, %26 : vector<8x128xi32>
    %c2_i32_5 = arith.constant 2 : i32
    %28 = vector.broadcast %c2_i32_5 : i32 to vector<8x128xi32>
    %29 = arith.cmpi eq, %25, %28 : vector<8x128xi32>
    %30 = arith.andi %6, %29 : vector<8x128xi1>
    %31 = arith.andi %7, %27 : vector<8x128xi1>
    %32 = arith.ori %30, %31 : vector<8x128xi1>
    %33 = arith.andi %6, %27 : vector<8x128xi1>
    %34 = arith.andi %7, %29 : vector<8x128xi1>
    %35 = arith.ori %33, %34 : vector<8x128xi1>
    %c2_i32_6 = arith.constant 2 : i32
    %36 = vector.broadcast %c2_i32_6 : i32 to vector<8x128xi32>
    %37 = arith.shrsi %0, %36 : vector<8x128xi32>
    %c3_i32_7 = arith.constant 3 : i32
    %38 = vector.broadcast %c3_i32_7 : i32 to vector<8x128xi32>
    %39 = arith.andi %37, %38 : vector<8x128xi32>
    %c1_i32_8 = arith.constant 1 : i32
    %40 = vector.broadcast %c1_i32_8 : i32 to vector<8x128xi32>
    %41 = arith.cmpi eq, %39, %40 : vector<8x128xi32>
    %c2_i32_9 = arith.constant 2 : i32
    %42 = vector.broadcast %c2_i32_9 : i32 to vector<8x128xi32>
    %43 = arith.cmpi eq, %39, %42 : vector<8x128xi32>
    %44 = arith.andi %6, %43 : vector<8x128xi1>
    %45 = arith.andi %7, %41 : vector<8x128xi1>
    %46 = arith.ori %44, %45 : vector<8x128xi1>
    %47 = arith.andi %6, %41 : vector<8x128xi1>
    %48 = arith.andi %7, %43 : vector<8x128xi1>
    %49 = arith.ori %47, %48 : vector<8x128xi1>
    %c3_i32_10 = arith.constant 3 : i32
    %50 = vector.broadcast %c3_i32_10 : i32 to vector<8x128xi32>
    %51 = arith.shrsi %0, %50 : vector<8x128xi32>
    %c3_i32_11 = arith.constant 3 : i32
    %52 = vector.broadcast %c3_i32_11 : i32 to vector<8x128xi32>
    %53 = arith.andi %51, %52 : vector<8x128xi32>
    %c1_i32_12 = arith.constant 1 : i32
    %54 = vector.broadcast %c1_i32_12 : i32 to vector<8x128xi32>
    %55 = arith.cmpi eq, %53, %54 : vector<8x128xi32>
    %c2_i32_13 = arith.constant 2 : i32
    %56 = vector.broadcast %c2_i32_13 : i32 to vector<8x128xi32>
    %57 = arith.cmpi eq, %53, %56 : vector<8x128xi32>
    %58 = arith.andi %6, %57 : vector<8x128xi1>
    %59 = arith.andi %7, %55 : vector<8x128xi1>
    %60 = arith.ori %58, %59 : vector<8x128xi1>
    %61 = arith.andi %6, %55 : vector<8x128xi1>
    %62 = arith.andi %7, %57 : vector<8x128xi1>
    %63 = arith.ori %61, %62 : vector<8x128xi1>
    %c4_i32 = arith.constant 4 : i32
    %64 = vector.broadcast %c4_i32 : i32 to vector<8x128xi32>
    %65 = arith.shrsi %0, %64 : vector<8x128xi32>
    %c3_i32_14 = arith.constant 3 : i32
    %66 = vector.broadcast %c3_i32_14 : i32 to vector<8x128xi32>
    %67 = arith.andi %65, %66 : vector<8x128xi32>
    %c1_i32_15 = arith.constant 1 : i32
    %68 = vector.broadcast %c1_i32_15 : i32 to vector<8x128xi32>
    %69 = arith.cmpi eq, %67, %68 : vector<8x128xi32>
    %c2_i32_16 = arith.constant 2 : i32
    %70 = vector.broadcast %c2_i32_16 : i32 to vector<8x128xi32>
    %71 = arith.cmpi eq, %67, %70 : vector<8x128xi32>
    %72 = arith.andi %6, %71 : vector<8x128xi1>
    %73 = arith.andi %7, %69 : vector<8x128xi1>
    %74 = arith.ori %72, %73 : vector<8x128xi1>
    %75 = arith.andi %6, %69 : vector<8x128xi1>
    %76 = arith.andi %7, %71 : vector<8x128xi1>
    %77 = arith.ori %75, %76 : vector<8x128xi1>
    %c5_i32 = arith.constant 5 : i32
    %78 = vector.broadcast %c5_i32 : i32 to vector<8x128xi32>
    %79 = arith.shrsi %0, %78 : vector<8x128xi32>
    %c3_i32_17 = arith.constant 3 : i32
    %80 = vector.broadcast %c3_i32_17 : i32 to vector<8x128xi32>
    %81 = arith.andi %79, %80 : vector<8x128xi32>
    %c1_i32_18 = arith.constant 1 : i32
    %82 = vector.broadcast %c1_i32_18 : i32 to vector<8x128xi32>
    %83 = arith.cmpi eq, %81, %82 : vector<8x128xi32>
    %c2_i32_19 = arith.constant 2 : i32
    %84 = vector.broadcast %c2_i32_19 : i32 to vector<8x128xi32>
    %85 = arith.cmpi eq, %81, %84 : vector<8x128xi32>
    %86 = arith.andi %6, %85 : vector<8x128xi1>
    %87 = arith.andi %7, %83 : vector<8x128xi1>
    %88 = arith.ori %86, %87 : vector<8x128xi1>
    %89 = arith.andi %6, %83 : vector<8x128xi1>
    %90 = arith.andi %7, %85 : vector<8x128xi1>
    %91 = arith.ori %89, %90 : vector<8x128xi1>
    %c64_i32 = arith.constant 64 : i32
    %92 = vector.broadcast %c64_i32 : i32 to vector<8x128xi32>
    %93 = arith.cmpi slt, %0, %92 : vector<8x128xi32>
    %c0_i32_20 = arith.constant 0 : i32
    %c8_i32 = arith.constant 8 : i32
    %94 = arith.muli %c0_i32_20, %c8_i32 : i32
    %95 = tpu.assume_multiple %94, 8 : i32
    %96 = arith.index_cast %95 : i32 to index
    %c0 = arith.constant 0 : index
    %97 = vector.load %arg1[%96, %c0] : memref<8x256xf32, #tpu.memory_space<vmem>>, vector<8x128xf32>
    %c1_i32_21 = arith.constant 1 : i32
    %98 = tpu.dynamic_rotate %97 by %c1_i32_21 dim 1 : vector<8x128xf32>, i32 -> vector<8x128xf32>
    %c127_i32_22 = arith.constant 127 : i32
    %99 = tpu.dynamic_rotate %97 by %c127_i32_22 dim 1 : vector<8x128xf32>, i32 -> vector<8x128xf32>
    %100 = arith.select %21, %99, %97 : vector<8x128xi1>, vector<8x128xf32>
    %101 = arith.select %18, %98, %100 : vector<8x128xi1>, vector<8x128xf32>
    %c2_i32_23 = arith.constant 2 : i32
    %102 = tpu.dynamic_rotate %101 by %c2_i32_23 dim 1 : vector<8x128xf32>, i32 -> vector<8x128xf32>
    %c126_i32 = arith.constant 126 : i32
    %103 = tpu.dynamic_rotate %101 by %c126_i32 dim 1 : vector<8x128xf32>, i32 -> vector<8x128xf32>
    %104 = arith.select %35, %103, %101 : vector<8x128xi1>, vector<8x128xf32>
    %105 = arith.select %32, %102, %104 : vector<8x128xi1>, vector<8x128xf32>
    %c4_i32_24 = arith.constant 4 : i32
    %106 = tpu.dynamic_rotate %105 by %c4_i32_24 dim 1 : vector<8x128xf32>, i32 -> vector<8x128xf32>
    %c124_i32 = arith.constant 124 : i32
    %107 = tpu.dynamic_rotate %105 by %c124_i32 dim 1 : vector<8x128xf32>, i32 -> vector<8x128xf32>
    %108 = arith.select %49, %107, %105 : vector<8x128xi1>, vector<8x128xf32>
    %109 = arith.select %46, %106, %108 : vector<8x128xi1>, vector<8x128xf32>
    %c8_i32_25 = arith.constant 8 : i32
    %110 = tpu.dynamic_rotate %109 by %c8_i32_25 dim 1 : vector<8x128xf32>, i32 -> vector<8x128xf32>
    %c120_i32 = arith.constant 120 : i32
    %111 = tpu.dynamic_rotate %109 by %c120_i32 dim 1 : vector<8x128xf32>, i32 -> vector<8x128xf32>
    %112 = arith.select %63, %111, %109 : vector<8x128xi1>, vector<8x128xf32>
    %113 = arith.select %60, %110, %112 : vector<8x128xi1>, vector<8x128xf32>
    %c16_i32 = arith.constant 16 : i32
    %114 = tpu.dynamic_rotate %113 by %c16_i32 dim 1 : vector<8x128xf32>, i32 -> vector<8x128xf32>
    %c112_i32 = arith.constant 112 : i32
    %115 = tpu.dynamic_rotate %113 by %c112_i32 dim 1 : vector<8x128xf32>, i32 -> vector<8x128xf32>
    %116 = arith.select %77, %115, %113 : vector<8x128xi1>, vector<8x128xf32>
    %117 = arith.select %74, %114, %116 : vector<8x128xi1>, vector<8x128xf32>
    %c32_i32 = arith.constant 32 : i32
    %118 = tpu.dynamic_rotate %117 by %c32_i32 dim 1 : vector<8x128xf32>, i32 -> vector<8x128xf32>
    %c96_i32 = arith.constant 96 : i32
    %119 = tpu.dynamic_rotate %117 by %c96_i32 dim 1 : vector<8x128xf32>, i32 -> vector<8x128xf32>
    %120 = arith.select %91, %119, %117 : vector<8x128xi1>, vector<8x128xf32>
    %121 = arith.select %88, %118, %120 : vector<8x128xi1>, vector<8x128xf32>
    %122 = arith.index_cast %95 : i32 to index
    %c128 = arith.constant 128 : index
    %123 = vector.load %arg1[%122, %c128] : memref<8x256xf32, #tpu.memory_space<vmem>>, vector<8x128xf32>
    %c1_i32_26 = arith.constant 1 : i32
    %124 = tpu.dynamic_rotate %123 by %c1_i32_26 dim 1 : vector<8x128xf32>, i32 -> vector<8x128xf32>
    %c127_i32_27 = arith.constant 127 : i32
    %125 = tpu.dynamic_rotate %123 by %c127_i32_27 dim 1 : vector<8x128xf32>, i32 -> vector<8x128xf32>
    %126 = arith.select %21, %125, %123 : vector<8x128xi1>, vector<8x128xf32>
    %127 = arith.select %18, %124, %126 : vector<8x128xi1>, vector<8x128xf32>
    %c2_i32_28 = arith.constant 2 : i32
    %128 = tpu.dynamic_rotate %127 by %c2_i32_28 dim 1 : vector<8x128xf32>, i32 -> vector<8x128xf32>
    %c126_i32_29 = arith.constant 126 : i32
    %129 = tpu.dynamic_rotate %127 by %c126_i32_29 dim 1 : vector<8x128xf32>, i32 -> vector<8x128xf32>
    %130 = arith.select %35, %129, %127 : vector<8x128xi1>, vector<8x128xf32>
    %131 = arith.select %32, %128, %130 : vector<8x128xi1>, vector<8x128xf32>
    %c4_i32_30 = arith.constant 4 : i32
    %132 = tpu.dynamic_rotate %131 by %c4_i32_30 dim 1 : vector<8x128xf32>, i32 -> vector<8x128xf32>
    %c124_i32_31 = arith.constant 124 : i32
    %133 = tpu.dynamic_rotate %131 by %c124_i32_31 dim 1 : vector<8x128xf32>, i32 -> vector<8x128xf32>
    %134 = arith.select %49, %133, %131 : vector<8x128xi1>, vector<8x128xf32>
    %135 = arith.select %46, %132, %134 : vector<8x128xi1>, vector<8x128xf32>
    %c8_i32_32 = arith.constant 8 : i32
    %136 = tpu.dynamic_rotate %135 by %c8_i32_32 dim 1 : vector<8x128xf32>, i32 -> vector<8x128xf32>
    %c120_i32_33 = arith.constant 120 : i32
    %137 = tpu.dynamic_rotate %135 by %c120_i32_33 dim 1 : vector<8x128xf32>, i32 -> vector<8x128xf32>
    %138 = arith.select %63, %137, %135 : vector<8x128xi1>, vector<8x128xf32>
    %139 = arith.select %60, %136, %138 : vector<8x128xi1>, vector<8x128xf32>
    %c16_i32_34 = arith.constant 16 : i32
    %140 = tpu.dynamic_rotate %139 by %c16_i32_34 dim 1 : vector<8x128xf32>, i32 -> vector<8x128xf32>
    %c112_i32_35 = arith.constant 112 : i32
    %141 = tpu.dynamic_rotate %139 by %c112_i32_35 dim 1 : vector<8x128xf32>, i32 -> vector<8x128xf32>
    %142 = arith.select %77, %141, %139 : vector<8x128xi1>, vector<8x128xf32>
    %143 = arith.select %74, %140, %142 : vector<8x128xi1>, vector<8x128xf32>
    %c32_i32_36 = arith.constant 32 : i32
    %144 = tpu.dynamic_rotate %143 by %c32_i32_36 dim 1 : vector<8x128xf32>, i32 -> vector<8x128xf32>
    %c96_i32_37 = arith.constant 96 : i32
    %145 = tpu.dynamic_rotate %143 by %c96_i32_37 dim 1 : vector<8x128xf32>, i32 -> vector<8x128xf32>
    %146 = arith.select %91, %145, %143 : vector<8x128xi1>, vector<8x128xf32>
    %147 = arith.select %88, %144, %146 : vector<8x128xi1>, vector<8x128xf32>
    %c64_i32_38 = arith.constant 64 : i32
    %148 = tpu.dynamic_rotate %147 by %c64_i32_38 dim 1 : vector<8x128xf32>, i32 -> vector<8x128xf32>
    %149 = arith.select %93, %121, %148 : vector<8x128xi1>, vector<8x128xf32>
    %150 = arith.index_cast %95 : i32 to index
    %c0_39 = arith.constant 0 : index
    %151 = vector.load %arg2[%150, %c0_39] : memref<8x128xf32, #tpu.memory_space<vmem>>, vector<8x128xf32>
    tpu.vector_store %arg2[%150, %c0_39], %149 {strides = array<i32>} : memref<8x128xf32, #tpu.memory_space<vmem>>, vector<8x128xf32>,
    %c64_i32_40 = arith.constant 64 : i32
    %152 = tpu.dynamic_rotate %121 by %c64_i32_40 dim 1 : vector<8x128xf32>, i32 -> vector<8x128xf32>
    %153 = arith.select %93, %152, %147 : vector<8x128xi1>, vector<8x128xf32>
    %154 = arith.index_cast %95 : i32 to index
    %c0_41 = arith.constant 0 : index
    %155 = vector.load %arg3[%154, %c0_41] : memref<8x128xf32, #tpu.memory_space<vmem>>, vector<8x128xf32>
    tpu.vector_store %arg3[%154, %c0_41], %153 {strides = array<i32>} : memref<8x128xf32, #tpu.memory_space<vmem>>, vector<8x128xf32>,
    %c1_i32_42 = arith.constant 1 : i32
    return
  }
  func.func @transform_0(%arg0: i32) -> (i32, i32) {
    %c0_i32 = arith.constant 0 : i32
    %c0_i32_0 = arith.constant 0 : i32
    return %arg0, %c0_i32 : i32, i32
  }
  func.func @transform_1(%arg0: i32) -> (i32, i32) {
    %c0_i32 = arith.constant 0 : i32
    %c0_i32_0 = arith.constant 0 : i32
    return %arg0, %c0_i32 : i32, i32
  }
  func.func @transform_2(%arg0: i32) -> (i32, i32) {
    %c0_i32 = arith.constant 0 : i32
    %c0_i32_0 = arith.constant 0 : i32
    return %arg0, %c0_i32 : i32, i32
  }
}

</mosaic_0001>

<bundles_post_ra>
// kernel: splitting_forward.1
= control target key start
LH: loop header
LB: loop body
LE: loop exit
PB: predicated region body
PF: predicated region fallthrough
CT: control target
= control target key end

     0   :  { %v10_v0 = vlaneseq  ;;  %s186_s11 = smov 127   ;;  %s187_s14 = smov 1   ;;  %vm188_vm3 = vmmov 1   ;;  %v573_v30 = vmov 0  ;;  %v575_v31 = vmov 0  ;;  %s534_s0 = inlined_call_operand.vmem [shape: f32[8,256], index: 0, kind: input, shape index: {}]   ;;  %s535_s2 = inlined_call_operand.vmem [shape: f32[8,128], index: 2, kind: output, shape index: {1}]   ;;  %s536_s1 = inlined_call_operand.vmem [shape: f32[8,128], index: 1, kind: output, shape index: {0}]  }
   0x1   :  { %v118_v1 = vld [vmem:[%s534_s0 + $0x8] sm:$0xff]  ;;  %v81_v3 = vld [vmem:[%s534_s0] sm:$0xff]  ;;  %s189_s0 = smov 126   ;;  %s190_s15 = smov 2   ;;  %v577_v33 = vmov 0  ;;  %v579_v34 = vmov 0 }
   0x2   :  { %v218_v2 = vand.u32 127, %v10_v0  ;;  %121 = vrot.lane.b32.xlu1 %v118_v1, %s186_s11  ;;  %v581_v36 = vmov 0  ;;  %v583_v37 = vmov 0  ;;  %v585_v39 = vmov 0  ;;  %s191_s16 = smov 124   ;;  %s192_s17 = smov 4  }
   0x3   :  { %v587_v40 = vmov 0  ;;  %v593_v44 = vmov 0  ;;  %v595_v45 = vmov 0  ;;  %s193_s18 = smov 120   ;;  %s194_s19 = smov 8  }
   0x4   :  { %12 = vrot.lane.b32.xlu0 %v218_v2, %s187_s14  ;;  %v171_v4 = vadd.s32 4294967295, %v218_v2  ;;  %v18_v5 = vand.u32 3, %v218_v2  ;;  %v27_v7 = vshra.s32 %v218_v2, 1  ;;  %v37_v16 = vshra.s32 %v218_v2, 2  ;;  %s195_s20 = smov 112   ;;  %s196_s21 = smov 16  }
   0x5   :  { %v47_v26 = vshra.s32 %v218_v2, 3  ;;  %v57_v32 = vshra.s32 %v218_v2, 4  ;;  %v67_v38 = vshra.s32 %v218_v2, 5  ;;  %s197_s22 = smov 96   ;;  %s198_s23 = smov 32  }
   0x6   :  { %82 = vrot.lane.b32.xlu1 %v81_v3, %s187_s14  ;;  %v15_v6 = vand.u32 127, %v171_v4  ;;  %vm227_vm0 = vcmp.eq.s32.totalorder %v18_v5, 1  ;;  %vm235_vm2 = vcmp.eq.s32.totalorder %v18_v5, 2  ;;  %v28_v14 = vand.u32 3, %v27_v7  ;;  %s199_s24 = smov 64  }
   0x7   :  { %v38_v21 = vand.u32 3, %v37_v16  ;;  %v48_v29 = vand.u32 3, %v47_v26  ;;  %v58_v35 = vand.u32 3, %v57_v32  ;;  %v68_v41 = vand.u32 3, %v67_v38 }
   0x8   :  { %84 = vrot.lane.b32.xlu0 %v81_v3, %s186_s11  ;;  %vm29_vm9 = vcmp.eq.s32.totalorder %v28_v14, 1  ;;  %vm30_vm11 = vcmp.eq.s32.totalorder %v28_v14, 2 }
   0xc   :  { %119 = vrot.lane.b32.xlu0 %v118_v1, %s187_s14 }
  0x74   :  { %v122_v10 = vpop.permute.xlu1 %121 }
  0x76   :  { %v13_v8 = vpop.permute.xlu0 %12 }
  0x77   :  { %vm231_vm1 = vcmp.eq.s32.totalorder %v13_v8, %v15_v6 }
  0x78   :  { %vm241_vm4 = vmxor %vm231_vm1, %vm188_vm3  ;;  %v83_v18 = vpop.permute.xlu1 %82 }
  0x79   :  { %vm24_vm5 = vmand %vm231_vm1, %vm227_vm0 }
  0x7a   :  { %vm25_vm6 = vmand %vm241_vm4, %vm235_vm2  ;;  %v85_v15 = vpop.permute.xlu0 %84 }
  0x7b   :  { %vm26_vm7 = vmor %vm24_vm5, %vm25_vm6  ;;  %vm40_vm5 = vcmp.eq.s32.totalorder %v38_v21, 2  ;;  %vm50_vm6 = vcmp.eq.s32.totalorder %v48_v29, 2 }
  0x7c   :  { %v86_v17 = vsel %vm26_vm7, %v85_v15, %v81_v3  ;;  %vm21_vm8 = vmand %vm231_vm1, %vm235_vm2  ;;  %v123_v19 = vsel %vm26_vm7, %v122_v10, %v118_v1  ;;  %vm39_vm2 = vcmp.eq.s32.totalorder %v38_v21, 1 }
  0x7d   :  { %vm22_vm10 = vmand %vm241_vm4, %vm227_vm0 }
  0x7e   :  { %vm23_vm12 = vmor %vm21_vm8, %vm22_vm10  ;;  %v120_v20 = vpop.permute.xlu0 %119 }
  0x7f   :  { %v87_v22 = vsel %vm23_vm12, %v83_v18, %v86_v17  ;;  %v124_v23 = vsel %vm23_vm12, %v120_v20, %v123_v19  ;;  %vm265_vm13 = vmand %vm231_vm1, %vm29_vm9 }
  0x80   :  { %90 = vrot.lane.b32.xlu1 %v87_v22, %s189_s0  ;;  %127 = vrot.lane.b32.xlu0 %v124_v23, %s189_s0  ;;  %vm271_vm14 = vmand %vm241_vm4, %vm30_vm11 }
  0x81   :  { %vm282_vm0 = vmand %vm231_vm1, %vm30_vm11  ;;  %vm49_vm11 = vcmp.eq.s32.totalorder %v48_v29, 1 }
  0x82   :  { %vm289_vm3 = vmand %vm241_vm4, %vm29_vm9 }
  0x83   :  { %vm299_vm7 = vmand %vm231_vm1, %vm39_vm2 }
  0x84   :  { %88 = vrot.lane.b32.xlu1 %v87_v22, %s190_s15  ;;  %125 = vrot.lane.b32.xlu0 %v124_v23, %s190_s15  ;;  %v574_v30 = vsel %vm299_vm7, 4294967295, %v573_v30  ;;  %vm305_vm8 = vmand %vm241_vm4, %vm40_vm5 }
  0x85   :  { %v576_v31 = vsel %vm305_vm8, 4294967295, %v575_v31  ;;  %vm316_vm10 = vmand %vm231_vm1, %vm40_vm5  ;;  %vm60_vm8 = vcmp.eq.s32.totalorder %v58_v35, 2 }
  0x86   :  { %v578_v33 = vsel %vm316_vm10, 4294967295, %v577_v33  ;;  %vm322_vm12 = vmand %vm241_vm4, %vm39_vm2 }
  0x87   :  { %v580_v34 = vsel %vm322_vm12, 4294967295, %v579_v34  ;;  %vm332_vm5 = vmand %vm231_vm1, %vm49_vm11  ;;  %vm59_vm12 = vcmp.eq.s32.totalorder %v58_v35, 1 }
  0x88   :  { %v582_v36 = vsel %vm332_vm5, 4294967295, %v581_v36  ;;  %vm338_vm9 = vmand %vm241_vm4, %vm50_vm6 }
  0x89   :  { %v584_v37 = vsel %vm338_vm9, 4294967295, %v583_v37  ;;  %vm349_vm15 = vmand %vm231_vm1, %vm50_vm6  ;;  %vm70_vm9 = vcmp.eq.s32.totalorder %v68_v41, 2 }
  0x8a   :  { %v586_v39 = vsel %vm349_vm15, 4294967295, %v585_v39  ;;  %vm355_vm10 = vmand %vm241_vm4, %vm49_vm11 }
  0x8b   :  { %v588_v40 = vsel %vm355_vm10, 4294967295, %v587_v40  ;;  %vm365_vm6 = vmand %vm231_vm1, %vm59_vm12  ;;  %vm69_vm10 = vcmp.eq.s32.totalorder %v68_v41, 1 }
  0x8c   :  { %vm371_vm2 = vmand %vm241_vm4, %vm60_vm8 }
  0x8d   :  { %vm381_vm7 = vmand %vm231_vm1, %vm60_vm8 }
  0x8e   :  { %v594_v44 = vsel %vm381_vm7, 4294967295, %v593_v44  ;;  %vm387_vm15 = vmand %vm241_vm4, %vm59_vm12 }
  0x8f   :  { %v596_v45 = vsel %vm387_vm15, 4294967295, %v595_v45  ;;  %vm397_vm11 = vmand %vm231_vm1, %vm69_vm10 }
  0x90   :  { %vm403_vm8 = vmand %vm241_vm4, %vm70_vm9 }
  0x91   :  { %vm76_vm12 = vmor %vm397_vm11, %vm403_vm8 }
  0x92   :  { %vm413_vm5 = vmand %vm231_vm1, %vm70_vm9 }
  0x93   :  { %vm419_vm15 = vmand %vm241_vm4, %vm69_vm10 }
  0x94   :  { %vm73_vm7 = vmor %vm413_vm5, %vm419_vm15 }
  0x95   :  { %vm605_vm1 = vmor %vm265_vm13, %vm271_vm14  ;;  %vm609_vm13 = vnez %v574_v30  ;;  %vm610_vm14 = vnez %v576_v31 }
  0x96   :  { %vm606_vm4 = vmmov %vm605_vm1 }
  0x97   :  { %vm607_vm9 = vmor %vm282_vm0, %vm289_vm3  ;;  %vm613_vm3 = vnez %v578_v33 }
  0x98   :  { %vm608_vm10 = vmmov %vm607_vm9 }
  0xf2   :  { %v91_v50 = vpop.permute.xlu1 %90  ;;  %v128_v51 = vpop.permute.xlu0 %127 }
  0xf3   :  { %v92_v52 = vsel %vm605_vm1, %v91_v50, %v87_v22  ;;  %v129_v53 = vsel %vm606_vm4, %v128_v51, %v124_v23  ;;  %vm611_vm1 = vmor %vm609_vm13, %vm610_vm14  ;;  %vm614_vm4 = vnez %v580_v34  ;;  %vm617_vm13 = vnez %v582_v36 }
  0xf4   :  { %vm612_vm0 = vmmov %vm611_vm1  ;;  %vm618_vm14 = vnez %v584_v37 }
  0xf6   :  { %v89_v54 = vpop.permute.xlu1 %88  ;;  %v126_v55 = vpop.permute.xlu0 %125 }
  0xf7   :  { %v93_v56 = vsel %vm607_vm9, %v89_v54, %v92_v52  ;;  %v130_v57 = vsel %vm608_vm10, %v126_v55, %v129_v53  ;;  %vm615_vm9 = vmor %vm613_vm3, %vm614_vm4  ;;  %vm621_vm3 = vnez %v586_v39  ;;  %vm622_vm4 = vnez %v588_v40 }
  0xf8   :  { %96 = vrot.lane.b32.xlu1 %v93_v56, %s191_s16  ;;  %133 = vrot.lane.b32.xlu0 %v130_v57, %s191_s16  ;;  %vm616_vm10 = vmmov %vm615_vm9 }
  0xfc   :  { %94 = vrot.lane.b32.xlu1 %v93_v56, %s192_s17  ;;  %131 = vrot.lane.b32.xlu0 %v130_v57, %s192_s17 }
 0x16a   :  { %v97_v58 = vpop.permute.xlu1 %96  ;;  %v134_v59 = vpop.permute.xlu0 %133 }
 0x16b   :  { %v98_v60 = vsel %vm611_vm1, %v97_v58, %v93_v56  ;;  %v135_v61 = vsel %vm612_vm0, %v134_v59, %v130_v57  ;;  %vm619_vm1 = vmor %vm617_vm13, %vm618_vm14 }
 0x16c   :  { %vm620_vm0 = vmmov %vm619_vm1 }
 0x16d   :  { %vm625_vm13 = vmor %vm365_vm6, %vm371_vm2  ;;  %vm77_vm2 = vcmp.lt.s32.totalorder %v218_v2, 64 }
 0x16e   :  { %v95_v62 = vpop.permute.xlu1 %94  ;;  %v132_v63 = vpop.permute.xlu0 %131  ;;  %vm626_vm14 = vmmov %vm625_vm13 }
 0x16f   :  { %v99_v0 = vsel %vm615_vm9, %v95_v62, %v98_v60  ;;  %v136_v1 = vsel %vm616_vm10, %v132_v63, %v135_v61  ;;  %vm623_vm9 = vmor %vm621_vm3, %vm622_vm4 }
 0x170   :  { %102 = vrot.lane.b32.xlu1 %v99_v0, %s193_s18  ;;  %139 = vrot.lane.b32.xlu0 %v136_v1, %s193_s18  ;;  %vm624_vm10 = vmmov %vm623_vm9 }
 0x174   :  { %100 = vrot.lane.b32.xlu1 %v99_v0, %s194_s19  ;;  %137 = vrot.lane.b32.xlu0 %v136_v1, %s194_s19 }
 0x1e2   :  { %v103_v3 = vpop.permute.xlu1 %102  ;;  %v140_v4 = vpop.permute.xlu0 %139 }
 0x1e3   :  { %v104_v5 = vsel %vm619_vm1, %v103_v3, %v99_v0  ;;  %v141_v6 = vsel %vm620_vm0, %v140_v4, %v136_v1  ;;  %vm627_vm1 = vnez %v594_v44  ;;  %vm628_vm0 = vnez %v596_v45 }
 0x1e4   :  { %vm629_vm3 = vmor %vm627_vm1, %vm628_vm0 }
 0x1e5   :  { %vm630_vm4 = vmmov %vm629_vm3 }
 0x1e6   :  { %v101_v7 = vpop.permute.xlu1 %100  ;;  %v138_v8 = vpop.permute.xlu0 %137 }
 0x1e7   :  { %v105_v9 = vsel %vm623_vm9, %v101_v7, %v104_v5  ;;  %v142_v10 = vsel %vm624_vm10, %v138_v8, %v141_v6 }
 0x1e8   :  { %108 = vrot.lane.b32.xlu1 %v105_v9, %s195_s20  ;;  %145 = vrot.lane.b32.xlu0 %v142_v10, %s195_s20 }
 0x1ec   :  { %106 = vrot.lane.b32.xlu1 %v105_v9, %s196_s21  ;;  %143 = vrot.lane.b32.xlu0 %v142_v10, %s196_s21 }
 0x25a   :  { %v109_v11 = vpop.permute.xlu1 %108  ;;  %v146_v12 = vpop.permute.xlu0 %145 }
 0x25b   :  { %v110_v13 = vsel %vm625_vm13, %v109_v11, %v105_v9  ;;  %v147_v14 = vsel %vm626_vm14, %v146_v12, %v142_v10 }
 0x25e   :  { %v107_v15 = vpop.permute.xlu1 %106  ;;  %v144_v16 = vpop.permute.xlu0 %143 }
 0x25f   :  { %v111_v17 = vsel %vm629_vm3, %v107_v15, %v110_v13  ;;  %v148_v18 = vsel %vm630_vm4, %v144_v16, %v147_v14 }
 0x260   :  { %114 = vrot.lane.b32.xlu1 %v111_v17, %s197_s22  ;;  %151 = vrot.lane.b32.xlu0 %v148_v18, %s197_s22 }
 0x264   :  { %112 = vrot.lane.b32.xlu1 %v111_v17, %s198_s23  ;;  %149 = vrot.lane.b32.xlu0 %v148_v18, %s198_s23 }
 0x2d2   :  { %v115_v19 = vpop.permute.xlu1 %114  ;;  %v152_v20 = vpop.permute.xlu0 %151 }
 0x2d3   :  { %v116_v21 = vsel %vm76_vm12, %v115_v19, %v111_v17  ;;  %v153_v22 = vsel %vm76_vm12, %v152_v20, %v148_v18 }
 0x2d6   :  { %v113_v23 = vpop.permute.xlu1 %112  ;;  %v150_v24 = vpop.permute.xlu0 %149 }
 0x2d7   :  { %v117_v25 = vsel %vm73_vm7, %v113_v23, %v116_v21  ;;  %v154_v26 = vsel %vm73_vm7, %v150_v24, %v153_v22 }
 0x2d8   :  { %159 = vrot.lane.b32.xlu0 %v117_v25, %s199_s24  ;;  %155 = vrot.lane.b32.xlu1 %v154_v26, %s199_s24 }
 0x34a   :  { %v160_v27 = vpop.permute.xlu0 %159  ;;  %v156_v28 = vpop.permute.xlu1 %155 }
 0x34b   :  { %v161_v29 = vsel %vm77_vm2, %v160_v27, %v154_v26  ;;  %v157_v30 = vsel %vm77_vm2, %v117_v25, %v156_v28 }
 0x34c   :  { %162 = vst [vmem:[%s535_s2] sm:$0xff] %v161_v29  ;;  %158 = vst [vmem:[%s536_s1] sm:$0xff] %v157_v30 }

</bundles_post_ra>
